<compile_context>
chip_gen: v7x
topology: tpu7x:2x2x1
jax: 0.10.0
libtpu: 0.0.40
codegen_flags: <defaults>
</compile_context>

<pallas_src>
import functools

import jax
import jax.numpy as jnp
from jax.experimental import pallas as pl
from jax.experimental.pallas import tpu as pltpu

_PAD_SENTINEL = 1e30  # finite "+inf" ||c||^2 for padded cluster lanes (0*1e30 == 0, no NaN)


def _round_up(x, m):
    return (x + m - 1) // m * m


def _vmem_limit_bytes():
    # Raise the scoped-VMEM budget (v5e default is only 16 MiB) while staying
    # inside physical capacity (64 MiB/TC on v7x, 128 MiB on v5e/v6e).
    try:
        cap = pltpu.get_tpu_info().vmem_capacity_bytes
    except Exception:
        cap = 64 * 1024 * 1024
    return int(min(cap * 3 // 4, 100 * 1024 * 1024))


def _tmc_kernel(z_ref, w_ref, b_ref, ct_ref, csq_ref, q_ref, loss_ref, *,
                tau, batch, tile_b, mxu_dtype):
    # hidden = z @ W^T + b  (f32 z read, in-kernel bf16 cast, f32 MXU accum,
    # f32 bias add).  D/H are padded to 128 on the host -> lane-dense.
    z = z_ref[...].astype(mxu_dtype)
    hidden = jnp.dot(z, w_ref[...], preferred_element_type=jnp.float32) + b_ref[...]

    # dist_sq = ||h||^2 + ||c||^2 - 2 h.c ; softmax is shift-invariant in the
    # per-row constant ||h||^2, so only d_shift feeds the softmax.  Padded
    # cluster lanes carry ||c||^2 = +1e30 (host-baked mask) -> q underflows
    # to exactly 0 there.
    h_sq = jnp.sum(hidden * hidden, axis=1, keepdims=True)            # (TB, 1)
    hc = jnp.dot(hidden.astype(mxu_dtype), ct_ref[...],
                 preferred_element_type=jnp.float32)                   # (TB, KP)
    d_shift = csq_ref[...] - 2.0 * hc

    logits = d_shift * (-1.0 / tau)
    m = jnp.max(logits, axis=1, keepdims=True)
    e = jnp.exp(logits - m)
    # approx reciprocal: EUP slot, ~1e-3 relative; within test tolerances.
    q = e * pl.reciprocal(jnp.sum(e, axis=1, keepdims=True), approx=True)
    q_ref[...] = q.astype(q_ref.dtype)

    # Per-tile partial loss.  sum_k q = 1  =>  sum_k q*dist_sq = ||h||^2 +
    # sum_k q*d_shift.  Padded cluster lanes contribute exactly 0 (q == 0,
    # d_shift finite); padded batch rows are masked out.
    row = (jax.lax.broadcasted_iota(jnp.int32, (tile_b, 1), 0)
           + pl.program_id(0) * tile_b)
    per_sample = h_sq + jnp.sum(q * d_shift, axis=1, keepdims=True)    # (TB, 1)
    per_sample = jnp.where(row < batch, per_sample, 0.0)
    tile_sum = jnp.sum(per_sample, axis=0, keepdims=True)              # (1, 1)
    # Fully (8,128)-aligned partial-loss block (unmasked store), value replicated.
    loss_ref[...] = jnp.broadcast_to(tile_sum, loss_ref.shape)


def tmc_forward(z, weight, bias, cluster_centers, tau=1.0, *,
                block_b=1024, mxu_dtype=jnp.bfloat16, q_dtype=jnp.float32):
    """Pallas implementation of TMC.forward. Returns (q, loss_scalar)."""
    z = jnp.asarray(z, jnp.float32)
    weight = jnp.asarray(weight, jnp.float32)
    bias = jnp.asarray(bias, jnp.float32)
    centers = jnp.asarray(cluster_centers, jnp.float32)

    B, D = z.shape
    H = weight.shape[0]
    K = centers.shape[0]

    # Lane-dense / MXU-friendly padded dims (zero padding is exact).
    DP = _round_up(D, 128)
    HP = _round_up(H, 128)
    KP = _round_up(K, 128)

    # Large batch tile (amortizes ~0.35us/step grid overhead), 16-row aligned
    # (bf16 sublane pack).  Guarantee >= 2 grid steps whenever B allows so the
    # "parallel" axis can shard across v7x's two TensorCores.
    TB = min(_round_up(block_b, 128), _round_up(B, 16))
    if B > 16 and _round_up(B, TB) // TB < 2:
        TB = _round_up(-(-B // 2), 16)           # exactly two tiles
    B_pad = _round_up(B, TB)
    n_tiles = B_pad // TB

    # Host prep.  z stays f32 (cast inside the kernel: 4 B/elem HBM read vs
    # ~8 B/elem for a separate XLA cast pass + bf16 kernel read).
    z_p = jnp.pad(z, ((0, B_pad - B), (0, DP - D)))                     # (B_pad, DP) f32
    w_t = jnp.pad(weight, ((0, HP - H), (0, DP - D))).astype(mxu_dtype).T  # (DP, HP)
    b2 = jnp.pad(bias, (0, HP - H)).reshape(1, HP)                      # (1, HP)  f32
    c_pad = jnp.pad(centers, ((0, KP - K), (0, HP - H)))                # (KP, HP) f32
    c_t = c_pad.astype(mxu_dtype).T                                     # (HP, KP)
    c_sq = jnp.sum(c_pad * c_pad, axis=1).reshape(1, KP)                # (1, KP)  f32
    # Bake the padded-cluster mask into ||c||^2 (finite sentinel, not inf).
    c_sq = jnp.where(jnp.arange(KP)[None, :] < K, c_sq,
                     jnp.float32(_PAD_SENTINEL))

    kernel = functools.partial(_tmc_kernel, tau=float(tau), batch=B,
                               tile_b=TB, mxu_dtype=mxu_dtype)

    q_pad, loss_parts = pl.pallas_call(
        kernel,
        out_shape=(
            jax.ShapeDtypeStruct((B_pad, KP), q_dtype),
            jax.ShapeDtypeStruct((n_tiles * 8, 128), jnp.float32),
        ),
        grid=(n_tiles,),
        in_specs=[
            pl.BlockSpec((TB, DP), lambda i: (i, 0)),     # z tile (pipelined)
            pl.BlockSpec((DP, HP), lambda i: (0, 0)),     # W^T, VMEM-resident
            pl.BlockSpec((1, HP), lambda i: (0, 0)),      # bias, resident
            pl.BlockSpec((HP, KP), lambda i: (0, 0)),     # centers^T, resident
            pl.BlockSpec((1, KP), lambda i: (0, 0)),      # ||c||^2 (+mask), resident
        ],
        out_specs=(
            pl.BlockSpec((TB, KP), lambda i: (i, 0)),     # q tile, lane-dense
            pl.BlockSpec((8, 128), lambda i: (i, 0)),     # per-tile loss block
        ),
        compiler_params=pltpu.CompilerParams(
            dimension_semantics=("parallel",),
            vmem_limit_bytes=_vmem_limit_bytes()),
    )(z_p, w_t, b2, c_t, c_sq)

    q = q_pad[:B, :K].astype(jnp.float32)
    # Each tile's (8,128) block holds its partial sum replicated; take one
    # representative element per tile and finish the global mean here.
    loss = jnp.sum(loss_parts[::8, 0]) / jnp.float32(B)
    return q, loss


def _reference_f32(z, weight, bias, centers, tau):
    """Module-faithful full-f32 reference."""
    hidden = z @ weight.T + bias
    diff = hidden[:, None, :] - centers[None, :, :]
    dist_sq = jnp.sum(diff ** 2, axis=2)
    q = jax.nn.softmax(-dist_sq / tau, axis=1)
    loss = jnp.mean(jnp.sum(q * dist_sq, axis=1))
    return q, loss


def _reference_mixed(z, weight, bias, centers, tau, mxu_dtype):
    """Mirrors the kernel's mixed precision (bf16 MXU operands, f32 accum)."""
    zc = z.astype(mxu_dtype).astype(jnp.float32)
    wc = weight.astype(mxu_dtype).astype(jnp.float32)
    cc = centers.astype(mxu_dtype).astype(jnp.float32)
    hidden = zc @ wc.T + bias
    h_sq = jnp.sum(hidden * hidden, axis=1, keepdims=True)
    hb = hidden.astype(mxu_dtype).astype(jnp.float32)
    c_sq = jnp.sum(centers * centers, axis=1)[None, :]
    d_shift = c_sq - 2.0 * (hb @ cc.T)
    q = jax.nn.softmax(-d_shift / tau, axis=1)          # shift-invariant form
    loss = jnp.mean(h_sq[:, 0] + jnp.sum(q * d_shift, axis=1))
    return q, loss


if __name__ == "__main__":
    # Small, deterministic configuration consistent with the module.
    B, input_dim, hidden_dim, num_clusters, tau = 24, 48, 64, 10, 1.0

    key = jax.random.PRNGKey(0)
    k_z, k_w, k_b, k_c = jax.random.split(key, 4)

    z = jax.random.normal(k_z, (B, input_dim), dtype=jnp.float32)

    # nn.Linear(input_dim, hidden_dim): weight (H, D), bias (H,)
    bound = 1.0 / jnp.sqrt(jnp.float32(input_dim))
    weight = jax.random.uniform(k_w, (hidden_dim, input_dim),
                                minval=-bound, maxval=bound, dtype=jnp.float32)
    bias = jax.random.uniform(k_b, (hidden_dim,),
                              minval=-bound, maxval=bound, dtype=jnp.float32)

    # cluster_centers: trunc_normal(std=0.1) then L2-normalized along dim 1
    centers = 0.1 * jax.random.truncated_normal(
        k_c, -2.0, 2.0, (num_clusters, hidden_dim), dtype=jnp.float32)
    centers = centers / jnp.linalg.norm(centers, axis=1, keepdims=True)

    # Default block_b with B=24 forces two batch tiles (n_tiles >= 2 rule) and
    # a non-divisible remainder, exercising the pipelined grid, padded-row loss
    # mask, padded D/H/K lanes, and the per-tile partial-loss reduction.
    q, loss = tmc_forward(z, weight, bias, centers, tau)
    jax.block_until_ready((q, loss))

    assert q.shape == (B, num_clusters)

    # Tight check against a reference that mirrors the kernel's numerics.
    q_m, loss_m = _reference_mixed(z, weight, bias, centers, tau, jnp.bfloat16)
    assert jnp.allclose(q, q_m, atol=5e-3, rtol=5e-3)
    assert jnp.allclose(loss, loss_m, atol=5e-3, rtol=5e-3)

    # Looser check against the module-faithful full-f32 reference.
    q_f, loss_f = _reference_f32(z, weight, bias, centers, tau)
    assert jnp.allclose(q, q_f, atol=3e-2, rtol=3e-2)
    assert jnp.allclose(loss, loss_f, atol=3e-2, rtol=3e-2)

    print("KERNEL_OK")
</pallas_src>

<mosaic_0001>
module attributes {stable_mosaic.version = 11 : i64} {
  func.func @_tmc_kernel(%arg0: i32, %arg1: memref<16x128xf32, #tpu.memory_space<vmem>>, %arg2: memref<128x128xbf16, #tpu.memory_space<vmem>>, %arg3: memref<1x128xf32, #tpu.memory_space<vmem>>, %arg4: memref<128x128xbf16, #tpu.memory_space<vmem>>, %arg5: memref<1x128xf32, #tpu.memory_space<vmem>>, %arg6: memref<16x128xf32, #tpu.memory_space<vmem>>, %arg7: memref<8x128xf32, #tpu.memory_space<vmem>>) attributes {dimension_semantics = [#tpu.dimension_semantics<parallel>], iteration_bounds = array<i64: 2>, scalar_prefetch = 0 : i64, scratch_operands = 0 : i64, tpu.core_type = #tpu.core_type<tc>, window_params = [{transform_indices = @transform_0, window_bounds = array<i64: 16, 128>}, {pipeline_mode = #tpu.pipeline_mode<synchronous>, transform_indices = @transform_1, window_bounds = array<i64: 128, 128>}, {pipeline_mode = #tpu.pipeline_mode<synchronous>, transform_indices = @transform_2, window_bounds = array<i64: 1, 128>}, {pipeline_mode = #tpu.pipeline_mode<synchronous>, transform_indices = @transform_3, window_bounds = array<i64: 128, 128>}, {pipeline_mode = #tpu.pipeline_mode<synchronous>, transform_indices = @transform_4, window_bounds = array<i64: 1, 128>}, {transform_indices = @transform_5, window_bounds = array<i64: 16, 128>}, {transform_indices = @transform_6, window_bounds = array<i64: 8, 128>}]} {
    %c0 = arith.constant 0 : index
    %c0_0 = arith.constant 0 : index
    %0 = vector.load %arg1[%c0, %c0_0] : memref<16x128xf32, #tpu.memory_space<vmem>>, vector<16x128xf32>
    %1 = arith.truncf %0 : vector<16x128xf32> to vector<16x128xbf16>
    %c0_1 = arith.constant 0 : index
    %c0_2 = arith.constant 0 : index
    %2 = vector.load %arg2[%c0_1, %c0_2] : memref<128x128xbf16, #tpu.memory_space<vmem>>, vector<128x128xbf16>
    %cst = arith.constant dense<0.000000e+00> : vector<16x128xf32>
    %3 = tpu.matmul %1, %2, %cst {dimension_numbers = #tpu.dot_dimension_numbers<[1], [0], [0], [1], [0, 0, 1, 1], [], []>} : vector<16x128xbf16>, vector<128x128xbf16>, vector<16x128xf32> -> vector<16x128xf32>
    %c0_3 = arith.constant 0 : index
    %c0_4 = arith.constant 0 : index
    %4 = vector.load %arg3[%c0_3, %c0_4] : memref<1x128xf32, #tpu.memory_space<vmem>>, vector<1x128xf32>
    %5 = vector.broadcast %4 : vector<1x128xf32> to vector<16x128xf32>
    %6 = arith.addf %3, %5 : vector<16x128xf32>
    %7 = arith.mulf %6, %6 : vector<16x128xf32>
    %cst_5 = arith.constant dense<0.000000e+00> : vector<16xf32>
    %8 = vector.multi_reduction <add>, %7, %cst_5 [1] : vector<16x128xf32> to vector<16xf32>
    %9 = vector.shape_cast %8 : vector<16xf32> to vector<16x1xf32>
    %10 = arith.truncf %6 : vector<16x128xf32> to vector<16x128xbf16>
    %c0_6 = arith.constant 0 : index
    %c0_7 = arith.constant 0 : index
    %11 = vector.load %arg4[%c0_6, %c0_7] : memref<128x128xbf16, #tpu.memory_space<vmem>>, vector<128x128xbf16>
    %cst_8 = arith.constant dense<0.000000e+00> : vector<16x128xf32>
    %12 = tpu.matmul %10, %11, %cst_8 {dimension_numbers = #tpu.dot_dimension_numbers<[1], [0], [0], [1], [0, 0, 1, 1], [], []>} : vector<16x128xbf16>, vector<128x128xbf16>, vector<16x128xf32> -> vector<16x128xf32>
    %c0_9 = arith.constant 0 : index
    %c0_10 = arith.constant 0 : index
    %13 = vector.load %arg5[%c0_9, %c0_10] : memref<1x128xf32, #tpu.memory_space<vmem>>, vector<1x128xf32>
    %cst_11 = arith.constant 2.000000e+00 : f32
    %14 = vector.broadcast %cst_11 : f32 to vector<16x128xf32>
    %15 = arith.mulf %14, %12 : vector<16x128xf32>
    %16 = vector.broadcast %13 : vector<1x128xf32> to vector<16x128xf32>
    %17 = arith.subf %16, %15 : vector<16x128xf32>
    %cst_12 = arith.constant -1.000000e+00 : f32
    %18 = vector.broadcast %cst_12 : f32 to vector<16x128xf32>
    %19 = arith.mulf %17, %18 : vector<16x128xf32>
    %cst_13 = arith.constant dense<0xFF800000> : vector<16xf32>
    %20 = vector.multi_reduction <maximumf>, %19, %cst_13 [1] : vector<16x128xf32> to vector<16xf32>
    %21 = vector.shape_cast %20 : vector<16xf32> to vector<16x1xf32>
    %22 = vector.broadcast %21 : vector<16x1xf32> to vector<16x128xf32>
    %23 = arith.subf %19, %22 : vector<16x128xf32>
    %24 = math.exp %23 : vector<16x128xf32>
    %cst_14 = arith.constant dense<0.000000e+00> : vector<16xf32>
    %25 = vector.multi_reduction <add>, %24, %cst_14 [1] : vector<16x128xf32> to vector<16xf32>
    %26 = vector.shape_cast %25 : vector<16xf32> to vector<16x1xf32>
    %27 = tpu.reciprocal %26 {approx = true} : vector<16x1xf32> -> vector<16x1xf32>
    %28 = vector.broadcast %27 : vector<16x1xf32> to vector<16x128xf32>
    %29 = arith.mulf %24, %28 : vector<16x128xf32>
    %c0_15 = arith.constant 0 : index
    %c0_16 = arith.constant 0 : index
    %30 = vector.load %arg6[%c0_15, %c0_16] : memref<16x128xf32, #tpu.memory_space<vmem>>, vector<16x128xf32>
    tpu.vector_store %arg6[%c0_15, %c0_16], %29 {strides = array<i32>} : memref<16x128xf32, #tpu.memory_space<vmem>>, vector<16x128xf32>,
    %31 = tpu.iota {dimensions = array<i32: 0>} : vector<16x1xi32>
    %c16_i32 = arith.constant 16 : i32
    %32 = arith.muli %arg0, %c16_i32 : i32
    %33 = vector.broadcast %32 : i32 to vector<16x1xi32>
    %34 = arith.addi %31, %33 : vector<16x1xi32>
    %35 = arith.mulf %29, %17 : vector<16x128xf32>
    %cst_17 = arith.constant dense<0.000000e+00> : vector<16xf32>
    %36 = vector.multi_reduction <add>, %35, %cst_17 [1] : vector<16x128xf32> to vector<16xf32>
    %37 = vector.shape_cast %36 : vector<16xf32> to vector<16x1xf32>
    %38 = arith.addf %9, %37 : vector<16x1xf32>
    %c24_i32 = arith.constant 24 : i32
    %39 = vector.broadcast %c24_i32 : i32 to vector<16x1xi32>
    %40 = arith.cmpi slt, %34, %39 : vector<16x1xi32>
    %cst_18 = arith.constant 0.000000e+00 : f32
    %41 = vector.broadcast %cst_18 : f32 to vector<16x1xf32>
    %42 = arith.select %40, %38, %41 : vector<16x1xi1>, vector<16x1xf32>
    %cst_19 = arith.constant dense<0.000000e+00> : vector<1xf32>
    %43 = vector.multi_reduction <add>, %42, %cst_19 [0] : vector<16x1xf32> to vector<1xf32>
    %44 = vector.shape_cast %43 : vector<1xf32> to vector<1x1xf32>
    %45 = vector.shape_cast %44 : vector<1x1xf32> to vector<1x1xf32>
    %46 = vector.broadcast %45 : vector<1x1xf32> to vector<8x128xf32>
    %c0_20 = arith.constant 0 : index
    %c0_21 = arith.constant 0 : index
    %47 = vector.load %arg7[%c0_20, %c0_21] : memref<8x128xf32, #tpu.memory_space<vmem>>, vector<8x128xf32>
    tpu.vector_store %arg7[%c0_20, %c0_21], %46 {strides = array<i32>} : memref<8x128xf32, #tpu.memory_space<vmem>>, vector<8x128xf32>,
    return
  }
  func.func @transform_0(%arg0: i32) -> (i32, i32) {
    %c0_i32 = arith.constant 0 : i32
    %c0_i32_0 = arith.constant 0 : i32
    return %arg0, %c0_i32 : i32, i32
  }
  func.func @transform_1(%arg0: i32) -> (i32, i32) {
    %c0_i32 = arith.constant 0 : i32
    %c0_i32_0 = arith.constant 0 : i32
    %c0_i32_1 = arith.constant 0 : i32
    return %c0_i32, %c0_i32_0 : i32, i32
  }
  func.func @transform_2(%arg0: i32) -> (i32, i32) {
    %c0_i32 = arith.constant 0 : i32
    %c0_i32_0 = arith.constant 0 : i32
    %c0_i32_1 = arith.constant 0 : i32
    return %c0_i32, %c0_i32_0 : i32, i32
  }
  func.func @transform_3(%arg0: i32) -> (i32, i32) {
    %c0_i32 = arith.constant 0 : i32
    %c0_i32_0 = arith.constant 0 : i32
    %c0_i32_1 = arith.constant 0 : i32
    return %c0_i32, %c0_i32_0 : i32, i32
  }
  func.func @transform_4(%arg0: i32) -> (i32, i32) {
    %c0_i32 = arith.constant 0 : i32
    %c0_i32_0 = arith.constant 0 : i32
    %c0_i32_1 = arith.constant 0 : i32
    return %c0_i32, %c0_i32_0 : i32, i32
  }
  func.func @transform_5(%arg0: i32) -> (i32, i32) {
    %c0_i32 = arith.constant 0 : i32
    %c0_i32_0 = arith.constant 0 : i32
    return %arg0, %c0_i32 : i32, i32
  }
  func.func @transform_6(%arg0: i32) -> (i32, i32) {
    %c0_i32 = arith.constant 0 : i32
    %c0_i32_0 = arith.constant 0 : i32
    return %arg0, %c0_i32 : i32, i32
  }
}

</mosaic_0001>

<bundles_post_ra>
// kernel: tpu_custom_call.1
= control target key start
LH: loop header
LB: loop body
LE: loop exit
PB: predicated region body
PF: predicated region fallthrough
CT: control target
= control target key end

     0   :  { %12 = vsyncpa [#allocation3], 0  ;;  %s1478_s0 = inlined_call_operand.hbm [shape: f32[32,128], index: 0, kind: input, shape index: {}]   ;;  %s1479_s1 = inlined_call_operand.hbm [shape: bf16[128,128], index: 1, kind: input, shape index: {}]   ;;  %s1480_s2 = inlined_call_operand.vmem [shape: f32[1,128], index: 2, kind: input, shape index: {}]   ;;  %s1481_s3 = inlined_call_operand.hbm [shape: bf16[128,128], index: 3, kind: input, shape index: {}]   ;;  %s1482_s4 = inlined_call_operand.vmem [shape: f32[1,128], index: 4, kind: input, shape index: {}]   ;;  %s1483_s5 = inlined_call_operand.hbm [shape: f32[32,128], index: 5, kind: output, shape index: {0}]   ;;  %s1484_s6 = inlined_call_operand.hbm [shape: f32[16,128], index: 6, kind: output, shape index: {1}]  }
   0x1   :  { %14 = vsyncpa [#allocation3 + $0x1], 0 }
   0x2   :  { %15 = vsyncpa [#allocation6], 0 }
   0x3   :  { %16 = vsyncpa [#allocation4], 0 }
   0x4   :  { %18 = vsyncpa [#allocation4 + $0x1], 0 }
   0x5   :  { %19 = vsyncpa [#allocation10], 0 }
   0x6   :  { %21 = vsyncpa [#allocation10 + $0x1], 0  ;;  %s1198_s21 = smov 0   ;;  %s1200_s22 = smov 0  }
   0x7   :  { %s1202_s23 = smov 0   ;;  %s1204_s24 = smov 0  }
   0x8 LB: > { %s1219_s25 = sadd.s32 4294967295, %s1148_s24   ;;  %s756_s26 = sadd.s32 4294967294, %s1148_s24   ;;  %s1148_s24 = sphi %s1204_s24, %s1504_s24   ;;  %s1144_s23 = sphi %s1202_s23, %s1503_s23   ;;  %s1140_s22 = sphi %s1200_s22, %s1502_s22   ;;  %s1136_s21 = sphi %s1198_s21, %s1501_s21  }
   0x9   : > { %p47_p0 = scmp.ne.s32.totalorder %s1140_s22, %s1136_s21  ;;  %p1485_p1 = scmp.eq.s32.totalorder %s1219_s25, 0 }
   0xa   : > { %p161_p3 = scmp.eq.s32.totalorder %s756_s26, 1  ;;  %p757_p5 = scmp.ge.s32.totalorder %s1148_s24, 1 }
   0xb   : > { %p1228_p4 = por %p1485_p1, %p47_p0  ;;  %p194_p7 = scmp.lt.s32.totalorder %s1148_s24, 3 }
   0xc   : > { %p1233_p6 = por %p161_p3, %p47_p0  ;;  %s1150_s30 = smov [#allocation5]  }
   0xd   : > { %s1488_s27 = scalar_select %p1228_p4, 1, 0 }
   0xe   : > { %s1489_s28 = scalar_select %p1233_p6, 1, 0 }
   0xf   : > { %p1238_p8 = pnand %p757_p5, %p194_p7  ;;  %s206_s7 = sshll.u32 %s1150_s30, 4  ;;  %s1242_s7 = int_to_ptr.vmem [resolvable:$true] %s206_s7 }
  0x10   : > { %s1151_s9 = smov [#allocation7]   ;;  %s960_s13 = scalar_lea.hbm %s1479_s1, 1024 }
  0x11   : > { %p870_p9 = pneg %p1238_p8  ;;  %s222_s10 = sshll.u32 %s1151_s9, 4  ;;  %s1253_s10 = int_to_ptr.vmem [resolvable:$true] %s222_s10 }
  0x12   : > { %p961_p12 = scmp.ne.s32.totalorder %s1479_s1, %s960_s13  ;;  %p967_p5 = scmp.lt.u32.totalorder %s960_s13, %s1479_s1 }
  0x13   : > { %p1249_p11 = pnand %p870_p9, %p1485_p1 }
  0x15   : > { %p962_p13 = pneg %p1249_p11 }
  0x17   : > { %p963_p0 = pnand %p962_p13, %p961_p12 }
  0x19   : > { %p964_p3 = pneg %p963_p0 }
  0x1b   : > { %p969_p7 = pnand %p967_p5, %p964_p3 }
  0x1d   : > { %972 = shalt.err (!%p969_p7)
}
  0x1e   : > { %s973_s18 = scalar_lea.vmem %s1242_s7, 1024  ;;  %p981_p2 = scmp.lt.s32.totalorder %s1242_s7, %s1242_s7 }
  0x1f   : > { %p974_p9 = scmp.ne.s32.totalorder %s1242_s7, %s973_s18  ;;  %p982_p12 = scmp.lt.s32.totalorder %s973_s18, %s973_s18 }
  0x21   : > { %p976_p10 = pnand %p974_p9, %p962_p13  ;;  %p983_p0 = por %p982_p12, %p981_p2 }
  0x23   : > { %p977_p1 = pneg %p976_p10 }
  0x25   : > { %p984_p6 = pnand %p983_p0, %p977_p1 }
  0x27   : > { %987 = shalt.err (!%p984_p6)
}
  0x28   : > { %s1152_s19 = smov 64   ;;  %s1153_s20 = smov 4  }
  0x29   : > { %873 = dma.hbm_to_vmem [thread:$0]  (!%p1249_p11), %s1479_s1, 1024, %s1242_s7, [#allocation6], %s1152_s19, %s1152_s19, %s1153_s20  }
  0x2a   : > { %s988_s12 = scalar_lea.hbm %s1481_s3, 1024 }
  0x2b   : > { %p989_p2 = scmp.ne.s32.totalorder %s1481_s3, %s988_s12  ;;  %p995_p10 = scmp.lt.u32.totalorder %s988_s12, %s1481_s3 }
  0x2d   : > { %p991_p1 = pnand %p989_p2, %p962_p13 }
  0x2f   : > { %p992_p6 = pneg %p991_p1 }
  0x31   : > { %p997_p3 = pnand %p995_p10, %p992_p6 }
  0x33   : > { %1000 = shalt.err (!%p997_p3)
}
  0x34   : > { %s1001_s7 = scalar_lea.vmem %s1253_s10, 1024  ;;  %p1009_p12 = scmp.lt.s32.totalorder %s1253_s10, %s1253_s10 }
  0x35   : > { %p1002_p5 = scmp.ne.s32.totalorder %s1253_s10, %s1001_s7  ;;  %p1010_p0 = scmp.lt.s32.totalorder %s1001_s7, %s1001_s7 }
  0x37   : > { %p1004_p7 = pnand %p1002_p5, %p962_p13  ;;  %p1011_p2 = por %p1010_p0, %p1009_p12 }
  0x39   : > { %p1005_p9 = pneg %p1004_p7 }
  0x3b   : > { %p1012_p1 = pnand %p1011_p2, %p1005_p9 }
  0x3d   : > { %1015 = shalt.err (!%p1012_p1)
}
  0x3e   : > { %876 = dma.hbm_to_vmem [thread:$0]  (!%p1249_p11), %s1481_s3, 1024, %s1253_s10, [#allocation6], %s1152_s19, %s1152_s19, %s1153_s20  }
  0x3f   : > { %s1308_s26 = sadd.s32 1, %s1148_s24   ;;  %s34_s8 = sadd.s32 1, %s1144_s23 }
  0x40   : > { %s31_s30 = ssub.s32 %s1148_s24, %s1308_s26  ;;  %p41_p13 = scmp.ne.s32.totalorder %s1144_s23, %s1140_s22 }
  0x41   : > { %p32_p6 = scmp.eq.s32.totalorder %s31_s30, 0  ;;  %p42_p10 = scmp.eq.s32.totalorder %s1148_s24, 0 }
  0x42   : > { %p1492_p3 = scmp.eq.s32.totalorder %s1219_s25, 1  ;;  %p890_p7 = scmp.lt.s32.totalorder %s1148_s24, 2 }
  0x43   : > { %s1324_s11 = scalar_select %p32_p6, %s1144_s23, %s34_s8  }
  0x44   : > { %p1318_p5 = por %p1492_p3, %p41_p13  ;;  %p43_p9 = por %p42_p10, %p41_p13 }
  0x45   : > { %s239_s12 = sand.u32 1, %s1144_s23   ;;  %s796_s10 = sshll.u32 %s1148_s24, 8 }
  0x46   : > { %s1493_s9 = scalar_select %p1318_p5, 1, 0 }
  0x47   : > { %s761_s13 = sshll.u32 %s239_s12, 4  ;;  %s1331_s14 = scalar_lea.hbm %s1478_s0, %s796_s10 }
  0x48   : > { %s243_s15 = scalar_lea.vmem [#allocation2], %s761_s13  ;;  %p1335_p11 = pnand %p890_p7, %p43_p9 }
  0x49   : > { %s250_s16 = sshll.u32 %s243_s15, 4  ;;  %s1339_s17 = scalar_lea.sflag [#allocation3], %s239_s12  ;;  %s1333_s16 = int_to_ptr.vmem [resolvable:$true] %s250_s16 }
  0x4a   : > { %s1016_s18 = scalar_lea.hbm %s1331_s14, 256  ;;  %p1018_p0 = pneg %p1335_p11 }
  0x4b   : > { %p1017_p12 = scmp.ne.s32.totalorder %s1331_s14, %s1016_s18  ;;  %s1021_s13 = scalar_lea.hbm %s1478_s0, 512 }
  0x4c   : > { %p1022_p13 = scmp.lt.u32.totalorder %s1331_s14, %s1478_s0  ;;  %p1023_p6 = scmp.lt.u32.totalorder %s1021_s13, %s1016_s18 }
  0x4d   : > { %p1019_p2 = pnand %p1018_p0, %p1017_p12  ;;  %p1025_p3 = scmp.lt.u32.totalorder %s1016_s18, %s1331_s14 }
  0x4e   : > { %p1024_p10 = por %p1023_p6, %p1022_p13 }
  0x4f   : > { %p1020_p1 = pneg %p1019_p2 }
  0x50   : > { %p1026_p7 = por %p1025_p3, %p1024_p10 }
  0x52   : > { %p1027_p9 = pnand %p1026_p7, %p1020_p1 }
  0x54   : > { %1030 = shalt.err (!%p1027_p9)
}
  0x55   : > { %s1031_s12 = scalar_lea.vmem %s1333_s16, 256  ;;  %s1154_s20 = smov [#allocation2]  }
  0x56   : > { %p1032_p12 = scmp.ne.s32.totalorder %s1333_s16, %s1031_s12  ;;  %s1036_s15 = sshll.u32 %s1154_s20, 4  ;;  %s1037_s15 = int_to_ptr.vmem [resolvable:$false] %s1036_s15 }
  0x57   : > { %s1038_s8 = scalar_lea.vmem %s1037_s15, 512  ;;  %p1039_p4 = scmp.lt.s32.totalorder %s1333_s16, %s1037_s15 }
  0x58   : > { %p1034_p2 = pnand %p1032_p12, %p1018_p0  ;;  %p1040_p13 = scmp.lt.s32.totalorder %s1038_s8, %s1031_s12 }
  0x5a   : > { %p1035_p5 = pneg %p1034_p2  ;;  %p1041_p6 = por %p1040_p13, %p1039_p4 }
  0x5c   : > { %p1042_p10 = pnand %p1041_p6, %p1035_p5 }
  0x5e   : > { %1045 = shalt.err (!%p1042_p10)
}
  0x5f   : > { %s1155_s18 = smov 128   ;;  %s1156_s30 = smov 8  }
  0x60   : > { %880 = dma.hbm_to_vmem [thread:$0]  (!%p1335_p11), %s1331_s14, 256, %s1333_s16, %s1339_s17, %s1155_s18, %s1155_s18, %s1156_s30  }
  0x61   : > { %262 = sbr.rel (%p1238_p8) target bundleno = 1069 (0x42d), region = 40  ;;  %s1370_s13 = sand.u32 (!%p1238_p8), 1, %s1140_s22  }
  0x62   : > { %s765_s10 = sshll.u32 (!%p1238_p8), %s1370_s13, 4  ;;  %s265_s19 = scalar_lea.sflag (!%p1238_p8), [#allocation3], %s1370_s13 }
  0x63   : > { %s1376_s12 = scalar_lea.vmem (!%p1238_p8), [#allocation2], %s765_s10  ;;  %p1495_p4 = scmp.ne.s32.totalorder (!%p1238_p8), %s1488_s27, 0 }
  0x68   : > { %1119 = dma.done.wait (%p1495_p4), %s265_s19, 256  }
  0x69   : > { %1121 = vsyncadd (%p1495_p4), %s265_s19, 4294967040  ;;  %p1496_p5 = scmp.eq.s32.totalorder %s1219_s25, 0 }
  0x6b   : > { %1123 = dma.done.wait (%p1496_p5), [#allocation6], 2048   ;;  %p1497_p8 = pmov %p1496_p5 }
  0x6c   : > { %v1157_v0 = vmov 0.0   ;;  %vm1158_vm0 = vmmov 0   ;;  %v936_v1 = vld [vmem:[#allocation5] sm:$0xff]   ;;  %v937_v2 = vld [vmem:[#allocation5 + $0x8] sm:$0xff]   ;;  %v938_v3 = vld [vmem:[#allocation5 + $0x10] sm:$0xff]   ;;  %s302_s7 = scalar_lea.vmem [#allocation8], %s765_s10 }
  0x6d   : > { %1125 = vsyncadd (%p1497_p8), [#allocation6], 4294965248  ;;  %816 = vmatprep.subr.bf16.mxu0 %v1157_v0  ;;  %832 = vmatprep.mubr.msk.bf16.mxu0 %vm1158_vm0, %v1157_v0  ;;  %v944_v4 = vld [vmem:[#allocation7] sm:$0xff]   ;;  %v939_v5 = vld [vmem:[#allocation5 + $0x18] sm:$0xff]   ;;  %s619_s17 = sshll.u32 %s302_s7, 4  ;;  %s797_s20 = sshll.u32 %s1219_s25, 8  ;;  %s1396_s17 = int_to_ptr.vmem [resolvable:$true] %s619_s17 }
  0x6e   : > { %836 = vmatprep.subr.bf16.mxu1 %v1157_v0  ;;  %852 = vmatprep.mubr.msk.bf16.mxu1 %vm1158_vm0, %v1157_v0  ;;  %v945_v6 = vld [vmem:[#allocation7 + $0x8] sm:$0xff]   ;;  %v940_v7 = vld [vmem:[#allocation5 + $0x20] sm:$0xff]   ;;  %v946_v8 = vld [vmem:[#allocation7 + $0x10] sm:$0xff]   ;;  %s1402_s18 = scalar_lea.hbm %s1483_s5, %s797_s20  ;;  %s601_s30 = scalar_lea.sflag [#allocation4], %s1370_s13 }
  0x6f   : > { %817 = vmatpush3.bf16.msra.mxu0 %v936_v1  ;;  %837 = vmatpush3.bf16.msra.mxu1 %v944_v4  ;;  %v941_v9 = vld [vmem:[#allocation5 + $0x28] sm:$0xff]   ;;  %v947_v10 = vld [vmem:[#allocation7 + $0x18] sm:$0xff]   ;;  %v942_v11 = vld [vmem:[#allocation5 + $0x30] sm:$0xff]   ;;  %s1046_s10 = scalar_lea.vmem %s1396_s17, 256  ;;  %p1498_p0 = scmp.ne.s32.totalorder %s1493_s9, 0 }
  0x70   : > { %818 = vmatprep.subr.bf16.mxu0 %v1157_v0  ;;  %838 = vmatprep.subr.bf16.mxu1 %v1157_v0  ;;  %v948_v12 = vld [vmem:[#allocation7 + $0x20] sm:$0xff]   ;;  %v943_v13 = vld [vmem:[#allocation5 + $0x38] sm:$0xff]   ;;  %v949_v16 = vld [vmem:[#allocation7 + $0x28] sm:$0xff]   ;;  %p1047_p11 = scmp.ne.s32.totalorder %s1396_s17, %s1046_s10  ;;  %s1159_s19 = smov [#allocation8]  }
  0x71   : > { %v313_v14 = vld [vmem:[%s1376_s12] sm:$0xff]  ;;  %v314_v15 = vld [vmem:[%s1376_s12 + $0x8] sm:$0xff]  ;;  %s1050_s12 = sshll.u32 %s1159_s19, 4  ;;  %s1051_s12 = int_to_ptr.vmem [resolvable:$false] %s1050_s12 }
  0x72   : > { %v315_v17 = vpack.c.bf16 %v314_v15, %v313_v14  ;;  %v950_v18 = vld [vmem:[#allocation7 + $0x30] sm:$0xff]   ;;  %v951_v19 = vld [vmem:[#allocation7 + $0x38] sm:$0xff]   ;;  %v770_v20 = vld [vmem:[%s1480_s2] ss:$0 sm:$0xff]  ;;  %p1048_p1 = pnand %p1047_p11, %p1498_p0  ;;  %s1052_s27 = scalar_lea.vmem %s1051_s12, 512 }
  0x73   : > { %819 = vmatpush3.bf16.msra.mxu0 %v937_v2  ;;  %839 = vmatpush3.bf16.msra.mxu1 %v945_v6  ;;  %v787_v29 = vld [vmem:[%s1482_s4] ss:$0 sm:$0xff]  ;;  %p1053_p7 = scmp.lt.s32.totalorder %s1396_s17, %s1051_s12  ;;  %p1054_p9 = scmp.lt.s32.totalorder %s1052_s27, %s1046_s10 }
  0x74   : > { %820 = vmatprep.subr.bf16.mxu0 %v1157_v0  ;;  %840 = vmatprep.subr.bf16.mxu1 %v1157_v0  ;;  %p1049_p3 = pneg %p1048_p1 }
  0x75   : > { %p1055_p12 = por %p1054_p9, %p1053_p7 }
  0x77   : > { %821 = vmatpush3.bf16.msra.mxu0 %v938_v3  ;;  %841 = vmatpush3.bf16.msra.mxu1 %v946_v8  ;;  %p1056_p2 = pnand %p1055_p12, %p1049_p3 }
  0x78   : > { %822 = vmatprep.subr.bf16.mxu0 %v1157_v0  ;;  %842 = vmatprep.subr.bf16.mxu1 %v1157_v0 }
  0x7b   : > { %823 = vmatpush3.bf16.msra.mxu0 %v939_v5  ;;  %843 = vmatpush3.bf16.msra.mxu1 %v947_v10 }
  0x7c   : > { %824 = vmatprep.subr.bf16.mxu0 %v1157_v0  ;;  %844 = vmatprep.subr.bf16.mxu1 %v1157_v0 }
  0x7f   : > { %825 = vmatpush3.bf16.msra.mxu0 %v940_v7  ;;  %845 = vmatpush3.bf16.msra.mxu1 %v948_v12 }
  0x80   : > { %826 = vmatprep.subr.bf16.mxu0 %v1157_v0  ;;  %846 = vmatprep.subr.bf16.mxu1 %v1157_v0 }
  0x83   : > { %827 = vmatpush3.bf16.msra.mxu0 %v941_v9  ;;  %847 = vmatpush3.bf16.msra.mxu1 %v949_v16 }
  0x84   : > { %828 = vmatprep.subr.bf16.mxu0 %v1157_v0  ;;  %848 = vmatprep.subr.bf16.mxu1 %v1157_v0 }
  0x87   : > { %829 = vmatpush3.bf16.msra.mxu0 %v942_v11  ;;  %849 = vmatpush3.bf16.msra.mxu1 %v950_v18 }
  0x88   : > { %830 = vmatprep.subr.bf16.mxu0 %v1157_v0  ;;  %850 = vmatprep.subr.bf16.mxu1 %v1157_v0 }
  0x8b   : > { %831 = vmatpush3.bf16.msra.mxu0 %v943_v13  ;;  %851 = vmatpush3.bf16.msra.mxu1 %v951_v19 }
  0x8e   : > { %833 = vmatmul.mubr.bf16.vlgmr.msra.gmra.mrb[0].mxu0 %v315_v17 }
 0x161   : > { %v421_v21 = vpop.f32.mrb[0].mxu0 }
 0x162   : > { %v834_v22 = vpop.f32.mrb[1].mxu0  ;;  %v422_v24 = vadd.f32 %v770_v20, %v421_v21 }
 0x163   : > { %v424_v23 = vpop.f32.mrb[2].mxu0 }
 0x164   : > { %v425_v25 = vadd.f32 %v770_v20, %v424_v23  ;;  %v835_v26 = vpop.f32.mrb[3].mxu0  ;;  %v428_v39 = vmul.f32 %v422_v24, %v422_v24 }
 0x166   : > { %v434_v27 = vpack.c.bf16 %v425_v25, %v422_v24  ;;  %v429_v48 = vmul.f32 %v425_v25, %v425_v25 }
 0x168   : > { %853 = vmatmul.mubr.bf16.vlgmr.msra.gmra.mrb[0].mxu1 %v434_v27 }
 0x23b   : > { %v533_v28 = vpop.f32.mrb[0].mxu1 }
 0x23c   : > { %v541_v30 = vmul.f32 2.0, %v533_v28  ;;  %v854_v31 = vpop.f32.mrb[1].mxu1 }
 0x23d   : > { %v536_v32 = vpop.f32.mrb[2].mxu1 }
 0x23e   : > { %v549_v33 = vsub.f32 %v787_v29, %v541_v30  ;;  %v542_v34 = vmul.f32 2.0, %v536_v32  ;;  %v855_v35 = vpop.f32.mrb[3].mxu1 }
 0x240   : > { %v550_v36 = vsub.f32 %v787_v29, %v542_v34  ;;  %v551_v37 = vmul.f32 -1.0, %v549_v33 }
 0x242   : > { %553 = vmax.xlane.f32.xlu0 %v551_v37  ;;  %v552_v38 = vmul.f32 -1.0, %v550_v36 }
 0x246   : > { %555 = vmax.xlane.f32.xlu0 %v552_v38 }
 0x24a   : > { %430 = vadd.xlane.f32.xlu0 %v428_v39 }
 0x2cf   : > { %v554_v40 = vpop.xlane.xlu0 %553 }
 0x2d0   : > { %v557_v41 = vsub.f32 %v551_v37, %v554_v40 }
 0x2d2   : > { %v559_v42 = vmul.f32 1.442695, %v557_v41 }
 0x2d3   : > { %v556_v43 = vpop.xlane.xlu0 %555 }
 0x2d4   : > { %952 = vpow2.f32 %v559_v42  ;;  %v558_v44 = vsub.f32 %v552_v38, %v556_v43 }
 0x2d6   : > { %v561_v45 = vmul.f32 1.442695, %v558_v44 }
 0x2d8   : > { %954 = vpow2.f32 %v561_v45 }
 0x2de   : > { %v953_v46 = vpop.eup %952 }
 0x2df   : > { %563 = vadd.xlane.f32.xlu1 %v953_v46 }
 0x2e2   : > { %v955_v47 = vpop.eup %954 }
 0x2e3   : > { %565 = vadd.xlane.f32.xlu1 %v955_v47 }
 0x2e7   : > { %432 = vadd.xlane.f32.xlu1 %v429_v48 }
 0x36c   : > { %v564_v49 = vpop.xlane.xlu1 %563 }
 0x36d   : > { %956 = vrcp.f32 %v564_v49 }
 0x370   : > { %v566_v50 = vpop.xlane.xlu1 %565 }
 0x371   : > { %958 = vrcp.f32 %v566_v50 }
 0x377   : > { %v957_v51 = vpop.eup %956 }
 0x378   : > { %v569_v52 = vmul.f32 %v957_v51, %v953_v46 }
 0x37a   : > { %571 = vst [vmem:[%s302_s7] sm:$0xff] %v569_v52  ;;  %v580_v53 = vmul.f32 %v569_v52, %v549_v33 }
 0x37b   : > { %v959_v54 = vpop.eup %958 }
 0x37c   : > { %582 = vadd.xlane.f32.xlu0 %v580_v53  ;;  %v570_v55 = vmul.f32 %v959_v54, %v955_v47 }
 0x37e   : > { %572 = vst [vmem:[%s302_s7 + $0x8] sm:$0xff] %v570_v55  ;;  %v581_v56 = vmul.f32 %v570_v55, %v550_v36 }
 0x380   : > { %584 = vadd.xlane.f32.xlu1 %v581_v56 }
 0x381   : > { %1059 = shalt.err (!%p1056_p2)
}
 0x382   : > { %s1060_s29 = scalar_lea.hbm %s1402_s18, 256  ;;  %s1064_s7 = scalar_lea.hbm %s1483_s5, 512 }
 0x383   : > { %p1061_p13 = scmp.ne.s32.totalorder %s1402_s18, %s1060_s29  ;;  %p1065_p4 = scmp.lt.u32.totalorder %s1402_s18, %s1483_s5 }
 0x384   : > { %p1066_p5 = scmp.lt.u32.totalorder %s1064_s7, %s1060_s29  ;;  %p1068_p11 = scmp.lt.u32.totalorder %s1060_s29, %s1402_s18 }
 0x385   : > { %p1062_p6 = pnand %p1061_p13, %p1498_p0 }
 0x386   : > { %p1067_p8 = por %p1066_p5, %p1065_p4 }
 0x387   : > { %p1063_p10 = pneg %p1062_p6 }
 0x388   : > { %p1069_p1 = por %p1068_p11, %p1067_p8 }
 0x38a   : > { %p1070_p3 = pnand %p1069_p1, %p1063_p10 }
 0x38c   : > { %1073 = shalt.err (!%p1070_p3)
}
 0x38d   : > { %s1160_s8 = smov 128   ;;  %s1161_s10 = smov 8   ;;  %v573_v57 = vlaneseq  ;;  %v431_v59 = vpop.xlane.xlu0 %430  ;;  %v433_v62 = vpop.xlane.xlu1 %432 }
 0x38e   : > { %866 = dma.vmem_to_hbm [thread:$0]  (%p1498_p0), %s1396_s17, 256, %s1402_s18, %s601_s30, %s1160_s8, %s1160_s8, %s1161_s10  }
 0x38f   : > { %v574_v58 = vshrl.u32 %v573_v57, 7  ;;  %s788_s19 = sshll.u32 %s1219_s25, 4  ;;  %s769_s17 = sshll.u32 %s1370_s13, 3 }
 0x390   : > { %v577_v61 = vstv %s788_s19  ;;  %s793_s18 = sshll.u32 %s1219_s25, 7  ;;  %s309_s30 = scalar_lea.vmem [#allocation9], %s769_s17 }
 0x391   : > { %v575_v60 = vadd.s32 8, %v574_v58  ;;  %v578_v63 = vadd.s32 %v577_v61, %v574_v58  ;;  %s635_s12 = sshll.u32 %s309_s30, 4  ;;  %s1434_s14 = scalar_lea.hbm %s1484_s6, %s793_s18  ;;  %s1436_s12 = int_to_ptr.vmem [resolvable:$true] %s635_s12 }
 0x392   : > { %s606_s16 = scalar_lea.sflag [#allocation10], %s1370_s13  ;;  %s1074_s7 = scalar_lea.vmem %s1436_s12, 128 }
 0x393   : > { %v579_v1 = vadd.s32 %v577_v61, %v575_v60  ;;  %vm588_vm1 = vcmp.lt.s32.totalorder %v578_v63, 24  ;;  %p1075_p7 = scmp.ne.s32.totalorder %s1436_s12, %s1074_s7  ;;  %s1162_s25 = smov [#allocation9]  }
 0x394   : > { %s1078_s20 = sshll.u32 %s1162_s25, 4  ;;  %s1079_s20 = int_to_ptr.vmem [resolvable:$false] %s1078_s20 }
 0x395   : > { %vm589_vm2 = vcmp.lt.s32.totalorder %v579_v1, 24  ;;  %p1076_p9 = pnand %p1075_p7, %p1498_p0  ;;  %s1080_s15 = scalar_lea.vmem %s1079_s20, 256 }
 0x396   : > { %p1081_p2 = scmp.lt.s32.totalorder %s1436_s12, %s1079_s20  ;;  %p1082_p13 = scmp.lt.s32.totalorder %s1080_s15, %s1074_s7 }
 0x397   : > { %p1077_p12 = pneg %p1076_p9 }
 0x398   : > { %p1083_p6 = por %p1082_p13, %p1081_p2 }
 0x39a   : > { %p1084_p10 = pnand %p1083_p6, %p1077_p12 }
 0x409   : > { %v583_v0 = vpop.xlane.xlu0 %582 }
 0x40a   : > { %v586_v2 = vadd.f32 %v583_v0, %v431_v59 }
 0x40c   : > { %v590_v5 = vsel %vm588_vm1, %v586_v2, 0.0 }
 0x40d   : > { %v585_v3 = vpop.xlane.xlu1 %584 }
 0x40e   : > { %v587_v4 = vadd.f32 %v585_v3, %v433_v62 }
 0x410   : > { %v591_v6 = vsel %vm589_vm2, %v587_v4, 0.0 }
 0x411   : > { %v592_v7 = vadd.f32 %v591_v6, %v590_v5 }
 0x413   : > { %v593_v8 = vrot.slane %v592_v7, 4 }
 0x415   : > { %v594_v9 = vadd.f32 %v593_v8, %v592_v7 }
 0x417   : > { %v595_v10 = vrot.slane %v594_v9, 2 }
 0x419   : > { %v596_v11 = vadd.f32 %v595_v10, %v594_v9 }
 0x41b   : > { %v597_v12 = vrot.slane %v596_v11, 1 }
 0x41d   : > { %v598_v13 = vadd.f32 %v597_v12, %v596_v11 }
 0x41f   : > { %599 = vst [vmem:[%s309_s30] sm:$0xff] %v598_v13 }
 0x420   : > { %1087 = shalt.err (!%p1084_p10)
}
 0x421   : > { %s1088_s13 = scalar_lea.hbm %s1434_s14, 128  ;;  %s1092_s19 = scalar_lea.hbm %s1484_s6, 256 }
 0x422   : > { %p1089_p4 = scmp.ne.s32.totalorder %s1434_s14, %s1088_s13  ;;  %p1093_p11 = scmp.lt.u32.totalorder %s1434_s14, %s1484_s6 }
 0x423   : > { %p1094_p1 = scmp.lt.u32.totalorder %s1092_s19, %s1088_s13  ;;  %p1096_p7 = scmp.lt.u32.totalorder %s1088_s13, %s1434_s14 }
 0x424   : > { %p1090_p5 = pnand %p1089_p4, %p1498_p0 }
 0x425   : > { %p1095_p3 = por %p1094_p1, %p1093_p11 }
 0x426   : > { %p1091_p8 = pneg %p1090_p5 }
 0x427   : > { %p1097_p9 = por %p1096_p7, %p1095_p3 }
 0x429   : > { %p1098_p12 = pnand %p1097_p9, %p1091_p8 }
 0x42b   : > { %1101 = shalt.err (!%p1098_p12)
}
 0x42c   : > { %867 = dma.vmem_to_hbm [thread:$0]  (%p1498_p0), %s1436_s12, 128, %s1434_s14, %s606_s16  }
 0x42d PF: > { %s647_s30 = sand.u32 1, %s1136_s21   ;;  %p1499_p2 = scmp.ne.s32.totalorder %s1489_s28, 0 }
 0x42e   : > { %p1500_p13 = scmp.ge.s32.totalorder %s1148_s24, 2  ;;  %s648_s27 = scalar_lea.sflag [#allocation4], %s647_s30 }
 0x430   : > { %p882_p6 = pnand %p1500_p13, %p1499_p2 }
 0x432   : > { %1127 = dma.done.wait (!%p882_p6), %s648_s27, 256  }
 0x433   : > { %1129 = vsyncadd (!%p882_p6), %s648_s27, 4294967040  ;;  %s657_s29 = scalar_lea.sflag [#allocation10], %s647_s30 }
 0x434   : > { %1131 = dma.done.wait (!%p882_p6), %s657_s29, 128  }
 0x435   : > { %1133 = vsyncadd (!%p882_p6), %s657_s29, 4294967168  ;;  %p24_p0 = scmp.ge.s32.totalorder %s1308_s26, 4   ;;  %s1501_s21 = smov %s1140_s22 }
 0x436   : > { %s1502_s22 = smov %s1144_s23  ;;  %s1503_s23 = smov %s1324_s11 }
 0x437   : > { %s1504_s24 = smov %s1308_s26  ;;  %26 = sbr.rel (!%p24_p0) target bundleno = 8 (0x8), region = 110 }
 0x43e   :  { %662 = vsyncpa [#allocation3], 1 }
 0x43f   :  { %664 = vsyncpa [#allocation3 + $0x1], 1 }
 0x440   :  { %665 = vsyncpa [#allocation6], 1 }
 0x441   :  { %666 = vsyncpa [#allocation4], 1 }
 0x442   :  { %668 = vsyncpa [#allocation4 + $0x1], 1 }
 0x443   :  { %669 = vsyncpa [#allocation10], 1 }
 0x444   :  { %671 = vsyncpa [#allocation10 + $0x1], 1 }

</bundles_post_ra>
